<compile_context>
chip_gen: v7x
topology: tpu7x:2x2x1
jax: 0.10.0
libtpu: 0.0.40
codegen_flags: <defaults>
</compile_context>

<pallas_src>
import jax
import jax.numpy as jnp
from jax.experimental import pallas as pl
from jax.experimental.pallas import tpu as pltpu


def _hbm_copy_kernel(r_hbm, o_hbm, sem):
    # Single whole-array HBM->HBM DMA: no VMEM bounce, no grid, no vld/vst.
    cp = pltpu.make_async_copy(r_hbm, o_hbm, sem)
    cp.start()
    cp.wait()


def _materialized_copy(r: jax.Array) -> jax.Array:
    """Fresh physical buffer holding the same values as r (HBM->HBM DMA)."""
    return pl.pallas_call(
        _hbm_copy_kernel,
        out_shape=jax.ShapeDtypeStruct(r.shape, r.dtype),
        in_specs=[pl.BlockSpec(memory_space=pl.ANY)],
        out_specs=pl.BlockSpec(memory_space=pl.ANY),
        scratch_shapes=[pltpu.SemaphoreType.DMA],
        compiler_params=pltpu.CompilerParams(has_side_effects=True),
        # Accurate hint for XLA's scheduler: pure mem-bound copy (N in, N out).
        cost_estimate=pl.CostEstimate(
            flops=0, transcendentals=0, bytes_accessed=2 * r.nbytes),
    )(r)


def relevance_propagation_relu(a: jax.Array, r: jax.Array,
                               *, materialize: bool = False) -> jax.Array:
    """LRP ReLU: relevance scores pass through unmodified.

    `a` mirrors the PyTorch forward signature but is never touched.

    By default this is a true no-op (returns `r`; XLA aliases the buffer).
    Set `materialize=True` only if the caller genuinely requires a distinct
    output buffer; that path does a single direct HBM->HBM DMA copy.
    """
    del a  # unused by the spec

    if not materialize or r.size == 0:
        # Best possible "kernel": don't launch anything.
        return r

    return _materialized_copy(r)


if __name__ == "__main__":
    key = jax.random.PRNGKey(0)
    ka, kr = jax.random.split(key)
    # Small NCHW shapes: batch=2, channels=4, spatial=16x16
    a = jax.random.normal(ka, (2, 4, 16, 16), dtype=jnp.float32)
    r = jax.random.normal(kr, (2, 4, 16, 16), dtype=jnp.float32)

    # Fast path: pure pass-through, no kernel launch.
    out_fast = relevance_propagation_relu(a, r)
    out_fast = jax.block_until_ready(out_fast)
    assert out_fast.shape == r.shape and out_fast.dtype == r.dtype
    assert bool(jnp.array_equal(out_fast, r))

    # Materialized path: exercises the Pallas HBM->HBM DMA copy kernel.
    out_copy = relevance_propagation_relu(a, r, materialize=True)
    out_copy = jax.block_until_ready(out_copy)
    assert out_copy.shape == r.shape and out_copy.dtype == r.dtype
    assert bool(jnp.array_equal(out_copy, r))

    # Ragged / non-128-divisible element count also works (no tiling involved).
    r_odd = jax.random.normal(kr, (3, 5, 7), dtype=jnp.float32)
    out_odd = jax.block_until_ready(
        relevance_propagation_relu(a, r_odd, materialize=True))
    assert bool(jnp.array_equal(out_odd, r_odd))

    print("KERNEL_OK")
</pallas_src>

<mosaic_0001>
module attributes {stable_mosaic.version = 11 : i64} {
  func.func @_hbm_copy_kernel(%arg0: memref<2x4x16x16xf32, #tpu.memory_space<any>>, %arg1: memref<2x4x16x16xf32, #tpu.memory_space<any>>, %arg2: memref<!tpu.dma_semaphore, #tpu.memory_space<semaphore_mem>>) attributes {dimension_semantics = [], scalar_prefetch = 0 : i64, scratch_operands = 1 : i64, tpu.core_type = #tpu.core_type<tc>} {
    tpu.enqueue_dma source(%arg0 : memref<2x4x16x16xf32, #tpu.memory_space<any>>) target(%arg1 : memref<2x4x16x16xf32, #tpu.memory_space<any>>) target_semaphore(%arg2 : memref<!tpu.dma_semaphore, #tpu.memory_space<semaphore_mem>>)
    tpu.wait_dma2 semaphore(%arg2 : memref<!tpu.dma_semaphore, #tpu.memory_space<semaphore_mem>>) src(%arg0 : memref<2x4x16x16xf32, #tpu.memory_space<any>>) dst(%arg1 : memref<2x4x16x16xf32, #tpu.memory_space<any>>)
    return
  }
}

</mosaic_0001>

<bundles_post_ra>
// kernel: tpu_custom_call.1
= control target key start
LH: loop header
LB: loop body
LE: loop exit
PB: predicated region body
PF: predicated region fallthrough
CT: control target
= control target key end

     0   :  { %s36_s6 = smov [#allocation2]   ;;  %s37_s7 = smov [#allocation3]   ;;  %s55_s0 = inlined_call_operand.hbm [shape: f32[2,4,16,16], index: 0, kind: input, shape index: {}]   ;;  %s56_s1 = inlined_call_operand.hbm [shape: f32[2,4,16,16], index: 1, kind: output, shape index: {}]  }
   0x1   :  { %s38_s8 = smov 0  }
   0x2   :  { %18 = dma.general %s55_s0, 2048, %s56_s1, %s36_s6, %s37_s7, [#allocation4], %s38_s8, 0  }
   0x3   :  { %34 = dma.done.wait [#allocation2], 2048 }
   0x4   :  { %35 = vsyncadd [#allocation2], 4294965248 }
   0x5   :  { %24 = vsyncmov [#allocation2] }
   0x8   :  { %s25_s13 = vpop.sfrf %24 }
   0x9   :  { %p30_p0 = scmp.ne.s32.totalorder %s25_s13, 0 }
   0xb   :  { %29 = shalt.err (%p30_p0)  }

</bundles_post_ra>
